<compile_context>
chip_gen: v7x
topology: tpu7x:2x2x1
jax: 0.10.0
libtpu: 0.0.40
codegen_flags: <defaults>
</compile_context>

<pallas_src>
import jax
import jax.numpy as jnp
from jax.experimental import pallas as pl
from jax.experimental.pallas import tpu as pltpu


# ----------------------------------------------------------------------------
# Fused CFRM kernel: one grid step == `nb` batch samples resident in VMEM.
#   x_ref, y_ref, o_ref : (nb, C, HW) tiles, caller's activation dtype
#   w1_ref              : (C, r) f32  == fc1.weight.T  (shared se_rgb weights)
#   w2_ref              : (C, r) f32  == fc2.weight
# ----------------------------------------------------------------------------
def _cfrm_kernel(x_ref, y_ref, w1_ref, w2_ref, o_ref):
    nb = x_ref.shape[0]
    w1 = w1_ref[...]                                   # (C, r)
    w2 = w2_ref[...]                                   # (C, r)

    def se_gate(feat):
        # feat: (C, HW) native dtype -> (C, 1) gate in f32.
        pooled = jnp.mean(feat.astype(jnp.float32), axis=-1, keepdims=True)  # GAP
        h = jnp.sum(w1 * pooled, axis=0, keepdims=True)      # (1, r)  fc1
        h = jnp.maximum(h, 0.0)                               # ReLU
        z = jnp.sum(w2 * h, axis=1, keepdims=True)            # (C, 1)  fc2
        # Exact sigmoid: gate math is <<1% of runtime; approx reciprocal would
        # only cost accuracy, not time (kernel is HBM-DMA bound).
        return 1.0 / (1.0 + jnp.exp(-z))

    # nb is a compile-time block size (typically 1-8): static per-sample loop.
    for b in range(nb):
        x_b = x_ref[b]                                 # (C, HW)
        y_b = y_ref[b]
        sx = se_gate(x_b).astype(x_b.dtype)            # (C, 1)
        sy = se_gate(y_b).astype(y_b.dtype)
        o_ref[b] = x_b * sx + y_b * sy                 # fused scale + add


# ----------------------------------------------------------------------------
# Tiling / buffering selection (per TPU generation).
# ----------------------------------------------------------------------------
def _vmem_capacity_bytes():
    try:
        return int(pltpu.get_tpu_info().vmem_capacity_bytes)
    except Exception:
        return 64 * 1024 * 1024   # conservative fallback (v7x per-TC VMEM)


def _pick_tiling(n, c, hw, itemsize, r):
    per_sample = c * hw * itemsize          # bytes of one (C, HW) sample
    weights = 2 * 2 * c * r * 4             # two (C, r) f32 weights, 2 bufs each
    physical = _vmem_capacity_bytes()
    budget = int(physical * 0.8)            # headroom for compiler scratch

    target = 2 * 1024 * 1024                # >=~2 MiB/input block amortizes ~0.35us/step

    # Samples per grid step: largest divisor of n that (a) keeps blocks <= target,
    # (b) leaves >= 2 grid steps when n >= 2 (v7x dual-TC load balance),
    # (c) fits VMEM double-buffered.
    nb = 1
    for d in sorted((d for d in range(1, n + 1) if n % d == 0), reverse=True):
        if n >= 2 and n // d < 2:
            continue
        if d > 1 and d * per_sample > target:
            continue
        if 3 * 2 * d * per_sample + weights > budget:
            continue
        nb = d
        break

    # Double-buffer when it fits; otherwise single-buffer (negligible overlap
    # loss since per-step compute is tiny vs DMA, but doubles the max sample).
    if 3 * 2 * nb * per_sample + weights <= budget:
        nbuf = 2
    else:
        nbuf = 1
    # TODO(synk): two-pass fallback for samples that do not fit even with nbuf=1.

    needed = 3 * nbuf * nb * per_sample + weights
    vmem_limit = min(int(physical * 0.9), needed + (16 << 20))
    return nb, nbuf, vmem_limit


# ----------------------------------------------------------------------------
# Forward wrapper.  x_nchw, y_nchw: (N, C, H, W) -> (N, C, H, W), native dtype.
# ----------------------------------------------------------------------------
def cfrm_forward(params, x_nchw, y_nchw, *, alias_x_to_out=False):
    n, c, h, w = x_nchw.shape
    hw = h * w
    x = x_nchw.reshape(n, c, hw)            # zero-copy; native dtype kept (bf16 stays bf16)
    y = y_nchw.reshape(n, c, hw)
    if y.dtype != x.dtype:
        y = y.astype(x.dtype)
    w1 = params["w1"].astype(jnp.float32)   # (C, r) == fc1.weight.T
    w2 = params["w2"].astype(jnp.float32)   # (C, r) == fc2.weight
    r = w1.shape[1]

    nb, nbuf, vmem_limit = _pick_tiling(n, c, hw, jnp.dtype(x.dtype).itemsize, r)

    def xio_spec():
        if nbuf == 2:   # default double-buffering
            return pl.BlockSpec((nb, c, hw), lambda i: (i, 0, 0))
        return pl.BlockSpec((nb, c, hw), lambda i: (i, 0, 0),
                            pipeline_mode=pl.Buffered(nbuf))

    kwargs = {}
    if alias_x_to_out:
        # Only enable when the caller donates x; otherwise XLA inserts a
        # defensive copy of x, ADDING a full HBM round trip.
        kwargs["input_output_aliases"] = {0: 0}

    out = pl.pallas_call(
        _cfrm_kernel,
        out_shape=jax.ShapeDtypeStruct((n, c, hw), x.dtype),
        grid_spec=pltpu.PrefetchScalarGridSpec(
            num_scalar_prefetch=0,
            grid=(n // nb,),
            in_specs=[
                xio_spec(),                              # x block
                xio_spec(),                              # y block
                pl.BlockSpec((c, r), lambda i: (0, 0)),  # W1 (resident)
                pl.BlockSpec((c, r), lambda i: (0, 0)),  # W2 (resident)
            ],
            out_specs=xio_spec(),
        ),
        compiler_params=pltpu.CompilerParams(
            dimension_semantics=("parallel",),           # batch blocks across TCs (v7x)
            vmem_limit_bytes=vmem_limit,
        ),
        **kwargs,
    )(x, y, w1, w2)
    return out.reshape(n, c, h, w)


# ----------------------------------------------------------------------------
# Synthetic parameter init (mirrors SELayer's bias-free Linear layers).
#   params["w1"] = fc1.weight.T  (C, r)
#   params["w2"] = fc2.weight    (C, r)
# ----------------------------------------------------------------------------
def init_cfrm(channel, reduction=16, seed=0):
    r = max(channel // reduction, 1)
    k1, k2 = jax.random.split(jax.random.PRNGKey(seed))
    fc1_w = jax.random.uniform(k1, (r, channel), jnp.float32,
                               -channel ** -0.5, channel ** -0.5)   # (r, C)
    fc2_w = jax.random.uniform(k2, (channel, r), jnp.float32,
                               -r ** -0.5, r ** -0.5)               # (C, r)
    return {"w1": fc1_w.T, "w2": fc2_w}


# Pure-JAX reference (matches the PyTorch module's math) for a correctness gate.
def cfrm_reference(params, x, y):
    fc1_w = params["w1"].T      # (r, C)
    fc2_w = params["w2"]        # (C, r)

    def se(f):
        p = jnp.mean(f, axis=(2, 3))                     # (N, C) adaptive avg pool
        h = jnp.maximum(p @ fc1_w.T, 0.0)                # (N, r)
        s = jax.nn.sigmoid(h @ fc2_w.T)                  # (N, C)
        return f * s[:, :, None, None]

    return se(x) + se(y)                                 # se_rgb used for both


if __name__ == "__main__":
    N, C, H, W = 2, 32, 16, 16                           # small test shapes
    kx, ky = jax.random.split(jax.random.PRNGKey(0))
    x = jax.random.normal(kx, (N, C, H, W), jnp.float32)
    y = jax.random.normal(ky, (N, C, H, W), jnp.float32)
    params = init_cfrm(C, reduction=16, seed=0)

    fwd = jax.jit(cfrm_forward)

    # f32 path (tight tolerance vs pure-JAX reference).
    out = jax.block_until_ready(fwd(params, x, y))
    assert out.shape == (N, C, H, W), out.shape
    assert out.dtype == jnp.float32, out.dtype
    assert bool(jnp.all(jnp.isfinite(out)))
    ref = cfrm_reference(params, x, y)
    max_err = float(jnp.max(jnp.abs(out - ref)))
    assert max_err < 1e-5, f"f32 mismatch vs reference: {max_err}"

    # bf16 path: activations stay bf16 end-to-end (gate math in f32 in-kernel).
    xb, yb = x.astype(jnp.bfloat16), y.astype(jnp.bfloat16)
    out_bf = jax.block_until_ready(fwd(params, xb, yb))
    assert out_bf.dtype == jnp.bfloat16, out_bf.dtype
    ref_bf = cfrm_reference(params, xb.astype(jnp.float32), yb.astype(jnp.float32))
    max_err_bf = float(jnp.max(jnp.abs(out_bf.astype(jnp.float32) - ref_bf)))
    assert max_err_bf < 6e-2, f"bf16 mismatch vs reference: {max_err_bf}"

    print("KERNEL_OK")
</pallas_src>

<mosaic_0001>
module attributes {stable_mosaic.version = 11 : i64} {
  func.func @_cfrm_kernel(%arg0: i32, %arg1: memref<1x32x256xf32, #tpu.memory_space<vmem>>, %arg2: memref<1x32x256xf32, #tpu.memory_space<vmem>>, %arg3: memref<32x2xf32, #tpu.memory_space<vmem>>, %arg4: memref<32x2xf32, #tpu.memory_space<vmem>>, %arg5: memref<1x32x256xf32, #tpu.memory_space<vmem>>) attributes {dimension_semantics = [#tpu.dimension_semantics<parallel>], iteration_bounds = array<i64: 2>, scalar_prefetch = 0 : i64, scratch_operands = 0 : i64, tpu.core_type = #tpu.core_type<tc>, window_params = [{transform_indices = @transform_0, window_bounds = array<i64: 1, 32, 256>}, {transform_indices = @transform_1, window_bounds = array<i64: 1, 32, 256>}, {pipeline_mode = #tpu.pipeline_mode<synchronous>, transform_indices = @transform_2, window_bounds = array<i64: 32, 2>}, {pipeline_mode = #tpu.pipeline_mode<synchronous>, transform_indices = @transform_3, window_bounds = array<i64: 32, 2>}, {transform_indices = @transform_4, window_bounds = array<i64: 1, 32, 256>}]} {
    %c0 = arith.constant 0 : index
    %c0_0 = arith.constant 0 : index
    %0 = vector.load %arg3[%c0, %c0_0] : memref<32x2xf32, #tpu.memory_space<vmem>>, vector<32x2xf32>
    %c0_1 = arith.constant 0 : index
    %c0_2 = arith.constant 0 : index
    %1 = vector.load %arg4[%c0_1, %c0_2] : memref<32x2xf32, #tpu.memory_space<vmem>>, vector<32x2xf32>
    %c0_3 = arith.constant 0 : index
    %c0_4 = arith.constant 0 : index
    %c0_5 = arith.constant 0 : index
    %2 = vector.load %arg1[%c0_3, %c0_4, %c0_5] : memref<1x32x256xf32, #tpu.memory_space<vmem>>, vector<1x32x256xf32>
    %3 = vector.shape_cast %2 : vector<1x32x256xf32> to vector<32x256xf32>
    %c0_6 = arith.constant 0 : index
    %c0_7 = arith.constant 0 : index
    %c0_8 = arith.constant 0 : index
    %4 = vector.load %arg2[%c0_6, %c0_7, %c0_8] : memref<1x32x256xf32, #tpu.memory_space<vmem>>, vector<1x32x256xf32>
    %5 = vector.shape_cast %4 : vector<1x32x256xf32> to vector<32x256xf32>
    %cst = arith.constant dense<0.000000e+00> : vector<32xf32>
    %6 = vector.multi_reduction <add>, %3, %cst [1] : vector<32x256xf32> to vector<32xf32>
    %7 = vector.shape_cast %6 : vector<32xf32> to vector<32x1xf32>
    %cst_9 = arith.constant 2.560000e+02 : f32
    %8 = vector.broadcast %cst_9 : f32 to vector<32x1xf32>
    %9 = arith.divf %7, %8 : vector<32x1xf32>
    %10 = vector.broadcast %9 : vector<32x1xf32> to vector<32x2xf32>
    %11 = arith.mulf %0, %10 : vector<32x2xf32>
    %cst_10 = arith.constant dense<0.000000e+00> : vector<2xf32>
    %12 = vector.multi_reduction <add>, %11, %cst_10 [0] : vector<32x2xf32> to vector<2xf32>
    %13 = vector.shape_cast %12 : vector<2xf32> to vector<1x2xf32>
    %cst_11 = arith.constant 0.000000e+00 : f32
    %14 = vector.broadcast %cst_11 : f32 to vector<1x2xf32>
    %15 = arith.maximumf %13, %14 : vector<1x2xf32>
    %16 = vector.broadcast %15 : vector<1x2xf32> to vector<32x2xf32>
    %17 = arith.mulf %1, %16 : vector<32x2xf32>
    %cst_12 = arith.constant dense<0.000000e+00> : vector<32xf32>
    %18 = vector.multi_reduction <add>, %17, %cst_12 [1] : vector<32x2xf32> to vector<32xf32>
    %19 = vector.shape_cast %18 : vector<32xf32> to vector<32x1xf32>
    %cst_13 = arith.constant 0.000000e+00 : f32
    %20 = vector.broadcast %cst_13 : f32 to vector<32x1xf32>
    %21 = arith.subf %20, %19 : vector<32x1xf32>
    %22 = math.exp %21 : vector<32x1xf32>
    %cst_14 = arith.constant 1.000000e+00 : f32
    %23 = vector.broadcast %cst_14 : f32 to vector<32x1xf32>
    %24 = arith.addf %23, %22 : vector<32x1xf32>
    %cst_15 = arith.constant 1.000000e+00 : f32
    %25 = vector.broadcast %cst_15 : f32 to vector<32x1xf32>
    %26 = arith.divf %25, %24 : vector<32x1xf32>
    %cst_16 = arith.constant dense<0.000000e+00> : vector<32xf32>
    %27 = vector.multi_reduction <add>, %5, %cst_16 [1] : vector<32x256xf32> to vector<32xf32>
    %28 = vector.shape_cast %27 : vector<32xf32> to vector<32x1xf32>
    %cst_17 = arith.constant 2.560000e+02 : f32
    %29 = vector.broadcast %cst_17 : f32 to vector<32x1xf32>
    %30 = arith.divf %28, %29 : vector<32x1xf32>
    %31 = vector.broadcast %30 : vector<32x1xf32> to vector<32x2xf32>
    %32 = arith.mulf %0, %31 : vector<32x2xf32>
    %cst_18 = arith.constant dense<0.000000e+00> : vector<2xf32>
    %33 = vector.multi_reduction <add>, %32, %cst_18 [0] : vector<32x2xf32> to vector<2xf32>
    %34 = vector.shape_cast %33 : vector<2xf32> to vector<1x2xf32>
    %cst_19 = arith.constant 0.000000e+00 : f32
    %35 = vector.broadcast %cst_19 : f32 to vector<1x2xf32>
    %36 = arith.maximumf %34, %35 : vector<1x2xf32>
    %37 = vector.broadcast %36 : vector<1x2xf32> to vector<32x2xf32>
    %38 = arith.mulf %1, %37 : vector<32x2xf32>
    %cst_20 = arith.constant dense<0.000000e+00> : vector<32xf32>
    %39 = vector.multi_reduction <add>, %38, %cst_20 [1] : vector<32x2xf32> to vector<32xf32>
    %40 = vector.shape_cast %39 : vector<32xf32> to vector<32x1xf32>
    %cst_21 = arith.constant 0.000000e+00 : f32
    %41 = vector.broadcast %cst_21 : f32 to vector<32x1xf32>
    %42 = arith.subf %41, %40 : vector<32x1xf32>
    %43 = math.exp %42 : vector<32x1xf32>
    %cst_22 = arith.constant 1.000000e+00 : f32
    %44 = vector.broadcast %cst_22 : f32 to vector<32x1xf32>
    %45 = arith.addf %44, %43 : vector<32x1xf32>
    %cst_23 = arith.constant 1.000000e+00 : f32
    %46 = vector.broadcast %cst_23 : f32 to vector<32x1xf32>
    %47 = arith.divf %46, %45 : vector<32x1xf32>
    %48 = vector.broadcast %26 : vector<32x1xf32> to vector<32x256xf32>
    %49 = arith.mulf %3, %48 : vector<32x256xf32>
    %50 = vector.broadcast %47 : vector<32x1xf32> to vector<32x256xf32>
    %51 = arith.mulf %5, %50 : vector<32x256xf32>
    %52 = arith.addf %49, %51 : vector<32x256xf32>
    %c0_24 = arith.constant 0 : index
    %c0_25 = arith.constant 0 : index
    %c0_26 = arith.constant 0 : index
    %53 = vector.load %arg5[%c0_24, %c0_25, %c0_26] : memref<1x32x256xf32, #tpu.memory_space<vmem>>, vector<1x32x256xf32>
    %54 = vector.shape_cast %53 : vector<1x32x256xf32> to vector<32x256xf32>
    %55 = vector.shape_cast %52 : vector<32x256xf32> to vector<1x32x256xf32>
    tpu.vector_store %arg5[%c0_24, %c0_25, %c0_26], %55 {strides = array<i32>} : memref<1x32x256xf32, #tpu.memory_space<vmem>>, vector<1x32x256xf32>,
    return
  }
  func.func @transform_0(%arg0: i32) -> (i32, i32, i32) {
    %c0_i32 = arith.constant 0 : i32
    %c0_i32_0 = arith.constant 0 : i32
    %c0_i32_1 = arith.constant 0 : i32
    return %arg0, %c0_i32, %c0_i32_0 : i32, i32, i32
  }
  func.func @transform_1(%arg0: i32) -> (i32, i32, i32) {
    %c0_i32 = arith.constant 0 : i32
    %c0_i32_0 = arith.constant 0 : i32
    %c0_i32_1 = arith.constant 0 : i32
    return %arg0, %c0_i32, %c0_i32_0 : i32, i32, i32
  }
  func.func @transform_2(%arg0: i32) -> (i32, i32) {
    %c0_i32 = arith.constant 0 : i32
    %c0_i32_0 = arith.constant 0 : i32
    %c0_i32_1 = arith.constant 0 : i32
    return %c0_i32, %c0_i32_0 : i32, i32
  }
  func.func @transform_3(%arg0: i32) -> (i32, i32) {
    %c0_i32 = arith.constant 0 : i32
    %c0_i32_0 = arith.constant 0 : i32
    %c0_i32_1 = arith.constant 0 : i32
    return %c0_i32, %c0_i32_0 : i32, i32
  }
  func.func @transform_4(%arg0: i32) -> (i32, i32, i32) {
    %c0_i32 = arith.constant 0 : i32
    %c0_i32_0 = arith.constant 0 : i32
    %c0_i32_1 = arith.constant 0 : i32
    return %arg0, %c0_i32, %c0_i32_0 : i32, i32, i32
  }
}

</mosaic_0001>

<bundles_post_ra>
// kernel: cfrm_forward.1
= control target key start
LH: loop header
LB: loop body
LE: loop exit
PB: predicated region body
PF: predicated region fallthrough
CT: control target
= control target key end

     0   :  { %s580_s15 = smov 0   ;;  %s719_s0 = inlined_call_operand.vmem [shape: f32[2,32,256], index: 0, kind: input, shape index: {}]   ;;  %s720_s1 = inlined_call_operand.vmem [shape: f32[2,32,256], index: 1, kind: input, shape index: {}]   ;;  %s721_s2 = inlined_call_operand.vmem [shape: f32[32,2], index: 2, kind: input, shape index: {}]   ;;  %s722_s3 = inlined_call_operand.vmem [shape: f32[32,2], index: 3, kind: input, shape index: {}]   ;;  %s723_s4 = inlined_call_operand.vmem [shape: f32[2,32,256], index: 4, kind: output, shape index: {}]  }
   0x1 LB: > { %s491_s16 = sadd.s32 4294967295, %s553_s15   ;;  %p495_p0 = scmp.ge.s32.totalorder %s553_s15, 1  ;;  %s553_s15 = sphi %s580_s15, %s14_s15  }
   0x2   : > { %p172_p1 = scmp.lt.s32.totalorder %s553_s15, 3 }
   0x4   : > { %p173_p2 = pnand %p495_p0, %p172_p1 }
   0x5   : > { %p203_p3 = scmp.lt.s32.totalorder (!%p173_p2), %s491_s16, 1  ;;  %v218_v27 = vld [vmem:[%s721_s2] sm:$0xff] (!%p173_p2)  ;;  %v219_v30 = vld [vmem:[%s721_s2 + $0x8] sm:$0xff] (!%p173_p2)  ;;  %vm263_vm0 = vcmask (!%p173_p2), 15360   ;;  %v220_v40 = vld [vmem:[%s721_s2 + $0x10] sm:$0xff] (!%p173_p2) }
   0x6   : > { %176 = sbr.rel (%p173_p2) target bundleno = 387 (0x183), region = 36  ;;  %v221_v49 = vld [vmem:[%s721_s2 + $0x18] sm:$0xff] (!%p173_p2) }
   0xd   : > { %s725_s16 = smov (!%p203_p3, %s491_s16), 1 }
   0xe   : > { %s588_s17 = sshll.u32 %s725_s16, 6 }
   0xf   : > { %s212_s20 = scalar_lea.vmem %s720_s1, %s588_s17  ;;  %s207_s23 = scalar_lea.vmem %s719_s0, %s588_s17 }
  0x10   : > { %v594_v0 = vld [vmem:[%s212_s20] sm:$0xff]  ;;  %v596_v1 = vld [vmem:[%s212_s20 + $0x8] sm:$0xff]  ;;  %v602_v2 = vld [vmem:[%s212_s20 + $0x10] sm:$0xff]  ;;  %s694_s18 = scalar_lea.vmem %s723_s4, %s588_s17 }
  0x11   : > { %v318_v3 = vadd.f32 %v596_v1, %v594_v0  ;;  %v606_v4 = vld [vmem:[%s207_s23] sm:$0xff]  ;;  %v608_v5 = vld [vmem:[%s207_s23 + $0x8] sm:$0xff]  ;;  %v610_v6 = vld [vmem:[%s212_s20 + $0x18] sm:$0xff] }
  0x12   : > { %v242_v7 = vadd.f32 %v608_v5, %v606_v4  ;;  %v614_v8 = vld [vmem:[%s207_s23 + $0x10] sm:$0xff]  ;;  %v616_v9 = vld [vmem:[%s207_s23 + $0x18] sm:$0xff]  ;;  %v321_v10 = vadd.f32 %v610_v6, %v602_v2  ;;  %v622_v12 = vld [vmem:[%s212_s20 + $0x20] sm:$0xff] }
  0x13   : > { %319 = vadd.xlane.f32.xlu1 %v318_v3  ;;  %v245_v11 = vadd.f32 %v616_v9, %v614_v8  ;;  %v624_v13 = vld [vmem:[%s212_s20 + $0x28] sm:$0xff]  ;;  %v626_v14 = vld [vmem:[%s207_s23 + $0x20] sm:$0xff]  ;;  %v634_v18 = vld [vmem:[%s212_s20 + $0x30] sm:$0xff] }
  0x14   : > { %243 = vadd.xlane.f32.xlu0 %v242_v7  ;;  %v628_v15 = vld [vmem:[%s207_s23 + $0x28] sm:$0xff]  ;;  %v324_v16 = vadd.f32 %v624_v13, %v622_v12  ;;  %v636_v19 = vld [vmem:[%s212_s20 + $0x38] sm:$0xff]  ;;  %v638_v20 = vld [vmem:[%s207_s23 + $0x30] sm:$0xff] }
  0x15   : > { %v248_v17 = vadd.f32 %v628_v15, %v626_v14  ;;  %v640_v21 = vld [vmem:[%s207_s23 + $0x38] sm:$0xff]  ;;  %v327_v22 = vadd.f32 %v636_v19, %v634_v18 }
  0x16   : > { %v251_v23 = vadd.f32 %v640_v21, %v638_v20 }
  0x17   : > { %322 = vadd.xlane.f32.xlu1 %v321_v10 }
  0x18   : > { %246 = vadd.xlane.f32.xlu0 %v245_v11 }
  0x1b   : > { %325 = vadd.xlane.f32.xlu1 %v324_v16 }
  0x1c   : > { %249 = vadd.xlane.f32.xlu0 %v248_v17 }
  0x1f   : > { %328 = vadd.xlane.f32.xlu1 %v327_v22 }
  0x20   : > { %252 = vadd.xlane.f32.xlu0 %v251_v23 }
  0xa0   : > { %v320_v24 = vpop.xlane.xlu1 %319 }
  0xa1   : > { %v330_v25 = vmul.f32 0.00390625, %v320_v24  ;;  %v244_v26 = vpop.xlane.xlu0 %243 }
  0xa2   : > { %v255_v33 = vmul.f32 0.00390625, %v244_v26 }
  0xa3   : > { %v334_v28 = vmul.f32 %v330_v25, %v218_v27 }
  0xa4   : > { %v323_v29 = vpop.xlane.xlu1 %322  ;;  %v259_v43 = vmul.f32 %v255_v33, %v218_v27  ;;  %v225_v33 = vld [vmem:[%s722_s3 + $0x18] sm:$0xff] }
  0xa5   : > { %v331_v31 = vmul.f32 0.00390625, %v323_v29  ;;  %v247_v32 = vpop.xlane.xlu0 %246  ;;  %v338_v35 = vsel %vm263_vm0, %v334_v28, 0.0  ;;  %v223_v29 = vld [vmem:[%s722_s3 + $0x8] sm:$0xff] }
  0xa6   : > { %v256_v34 = vmul.f32 0.00390625, %v247_v32  ;;  %v264_v54 = vsel %vm263_vm0, %v259_v43, 0.0 }
  0xa7   : > { %v335_v36 = vmul.f32 %v331_v31, %v219_v30 }
  0xa8   : > { %v260_v37 = vmul.f32 %v256_v34, %v219_v30  ;;  %v326_v38 = vpop.xlane.xlu1 %325  ;;  %v222_v30 = vld [vmem:[%s722_s3] sm:$0xff]  ;;  %v224_v34 = vld [vmem:[%s722_s3 + $0x10] sm:$0xff] }
  0xa9   : > { %v339_v39 = vsel %vm263_vm0, %v335_v36, 0.0  ;;  %v332_v41 = vmul.f32 0.00390625, %v326_v38  ;;  %v250_v42 = vpop.xlane.xlu0 %249 }
  0xaa   : > { %v340_v44 = vadd.f32 %v339_v39, %v338_v35  ;;  %v257_v45 = vmul.f32 0.00390625, %v250_v42  ;;  %v265_v47 = vsel %vm263_vm0, %v260_v37, 0.0 }
  0xab   : > { %v336_v46 = vmul.f32 %v332_v41, %v220_v40  ;;  %v266_v58 = vadd.f32 %v265_v47, %v264_v54 }
  0xac   : > { %v261_v48 = vmul.f32 %v257_v45, %v220_v40  ;;  %v329_v50 = vpop.xlane.xlu1 %328 }
  0xad   : > { %v341_v51 = vsel %vm263_vm0, %v336_v46, 0.0  ;;  %v333_v52 = vmul.f32 0.00390625, %v329_v50  ;;  %v253_v53 = vpop.xlane.xlu0 %252 }
  0xae   : > { %v342_v55 = vadd.f32 %v341_v51, %v340_v44  ;;  %v267_v56 = vsel %vm263_vm0, %v261_v48, 0.0  ;;  %v258_v57 = vmul.f32 0.00390625, %v253_v53 }
  0xaf   : > { %v337_v59 = vmul.f32 %v333_v52, %v221_v49  ;;  %v268_v61 = vadd.f32 %v267_v56, %v266_v58 }
  0xb0   : > { %v262_v60 = vmul.f32 %v258_v57, %v221_v49 }
  0xb1   : > { %v343_v62 = vsel %vm263_vm0, %v337_v59, 0.0 }
  0xb2   : > { %v344_v63 = vadd.f32 %v343_v62, %v342_v55  ;;  %v269_v3 = vsel %vm263_vm0, %v262_v60, 0.0 }
  0xb3   : > { %v270_v7 = vadd.f32 %v269_v3, %v268_v61 }
  0xb4   : > { %v345_v10 = vrot.slane %v344_v63, 4 }
  0xb5   : > { %v271_v11 = vrot.slane %v270_v7, 4 }
  0xb6   : > { %v346_v16 = vadd.f32 %v345_v10, %v344_v63 }
  0xb7   : > { %v272_v17 = vadd.f32 %v271_v11, %v270_v7 }
  0xb8   : > { %v347_v22 = vrot.slane %v346_v16, 2 }
  0xb9   : > { %v273_v23 = vrot.slane %v272_v17, 2 }
  0xba   : > { %v348_v24 = vadd.f32 %v347_v22, %v346_v16 }
  0xbb   : > { %v274_v25 = vadd.f32 %v273_v23, %v272_v17 }
  0xbc   : > { %v349_v26 = vrot.slane %v348_v24, 1 }
  0xbd   : > { %v275_v27 = vrot.slane %v274_v25, 1 }
  0xbe   : > { %v350_v31 = vadd.f32 %v349_v26, %v348_v24 }
  0xbf   : > { %v276_v28 = vadd.f32 %v275_v27, %v274_v25 }
  0xc0   : > { %v351_v37 = vmax.f32 %v350_v31, 0.0 }
  0xc1   : > { %v277_v32 = vmax.f32 %v276_v28, 0.0 }
  0xc2   : > { %v353_v44 = vmul.f32 %v351_v37, %v223_v29  ;;  %v352_v45 = vmul.f32 %v351_v37, %v222_v30  ;;  %v355_v48 = vmul.f32 %v351_v37, %v225_v33  ;;  %v354_v49 = vmul.f32 %v351_v37, %v224_v34 }
  0xc3   : > { %v279_v35 = vmul.f32 %v277_v32, %v223_v29  ;;  %v278_v36 = vmul.f32 %v277_v32, %v222_v30  ;;  %v281_v40 = vmul.f32 %v277_v32, %v225_v33  ;;  %v280_v41 = vmul.f32 %v277_v32, %v224_v34 }
  0xc4   : > { %v359_v46 = vsel %vm263_vm0, %v353_v44, 0.0  ;;  %v356_v47 = vsel %vm263_vm0, %v352_v45, 0.0  ;;  %v365_v50 = vsel %vm263_vm0, %v355_v48, 0.0  ;;  %v362_v51 = vsel %vm263_vm0, %v354_v49, 0.0 }
  0xc5   : > { %v285_v38 = vsel %vm263_vm0, %v279_v35, 0.0  ;;  %v282_v39 = vsel %vm263_vm0, %v278_v36, 0.0  ;;  %v291_v42 = vsel %vm263_vm0, %v281_v40, 0.0  ;;  %v288_v43 = vsel %vm263_vm0, %v280_v41, 0.0 }
  0xc6   : > { %286 = vadd.xlane.f32.xlu1 %v285_v38  ;;  %283 = vadd.xlane.f32.xlu0 %v282_v39 }
  0xca   : > { %292 = vadd.xlane.f32.xlu1 %v291_v42  ;;  %289 = vadd.xlane.f32.xlu0 %v288_v43 }
  0xce   : > { %360 = vadd.xlane.f32.xlu1 %v359_v46  ;;  %357 = vadd.xlane.f32.xlu0 %v356_v47 }
  0xd2   : > { %366 = vadd.xlane.f32.xlu1 %v365_v50  ;;  %363 = vadd.xlane.f32.xlu0 %v362_v51 }
 0x153   : > { %v287_v52 = vpop.xlane.xlu1 %286  ;;  %v284_v53 = vpop.xlane.xlu0 %283 }
 0x154   : > { %v295_v54 = vsub.f32 0.0, %v287_v52  ;;  %v294_v55 = vsub.f32 0.0, %v284_v53 }
 0x156   : > { %v300_v56 = vmul.f32 1.442695, %v295_v54  ;;  %v298_v57 = vmul.f32 1.442695, %v294_v55 }
 0x157   : > { %v293_v58 = vpop.xlane.xlu1 %292  ;;  %v290_v59 = vpop.xlane.xlu0 %289 }
 0x158   : > { %v297_v60 = vsub.f32 0.0, %v293_v58  ;;  %v296_v61 = vsub.f32 0.0, %v290_v59  ;;  %515 = vpow2.f32 %v300_v56 }
 0x159   : > { %517 = vpow2.f32 %v298_v57 }
 0x15a   : > { %v304_v62 = vmul.f32 1.442695, %v297_v60  ;;  %v302_v63 = vmul.f32 1.442695, %v296_v61 }
 0x15b   : > { %v361_v3 = vpop.xlane.xlu1 %360  ;;  %v358_v7 = vpop.xlane.xlu0 %357 }
 0x15c   : > { %v369_v10 = vsub.f32 0.0, %v361_v3  ;;  %v368_v11 = vsub.f32 0.0, %v358_v7  ;;  %519 = vpow2.f32 %v304_v62 }
 0x15d   : > { %521 = vpow2.f32 %v302_v63 }
 0x15e   : > { %v374_v16 = vmul.f32 1.442695, %v369_v10  ;;  %v372_v17 = vmul.f32 1.442695, %v368_v11 }
 0x15f   : > { %v367_v22 = vpop.xlane.xlu1 %366  ;;  %v364_v23 = vpop.xlane.xlu0 %363 }
 0x160   : > { %523 = vpow2.f32 %v374_v16  ;;  %v371_v24 = vsub.f32 0.0, %v367_v22  ;;  %v370_v25 = vsub.f32 0.0, %v364_v23 }
 0x161   : > { %525 = vpow2.f32 %v372_v17 }
 0x162   : > { %v378_v26 = vmul.f32 1.442695, %v371_v24  ;;  %v376_v27 = vmul.f32 1.442695, %v370_v25  ;;  %v516_v28 = vpop.eup %515 }
 0x163   : > { %v518_v29 = vpop.eup %517  ;;  %v307_v30 = vadd.f32 1.0, %v516_v28 }
 0x164   : > { %527 = vpow2.f32 %v378_v26  ;;  %v306_v32 = vadd.f32 1.0, %v518_v29 }
 0x165   : > { %529 = vpow2.f32 %v376_v27 }
 0x166   : > { %v520_v31 = vpop.eup %519  ;;  %531 = vrcp.f32 %v307_v30 }
 0x167   : > { %v522_v33 = vpop.eup %521  ;;  %v309_v36 = vadd.f32 1.0, %v520_v31  ;;  %533 = vrcp.f32 %v306_v32 }
 0x168   : > { %v308_v40 = vadd.f32 1.0, %v522_v33 }
 0x16a   : > { %v524_v34 = vpop.eup %523 }
 0x16b   : > { %v526_v35 = vpop.eup %525  ;;  %v381_v37 = vadd.f32 1.0, %v524_v34 }
 0x16c   : > { %v380_v38 = vadd.f32 1.0, %v526_v35 }
 0x16d   : > { %535 = vrcp.f32 %v381_v37 }
 0x16e   : > { %v528_v39 = vpop.eup %527  ;;  %537 = vrcp.f32 %v380_v38 }
 0x16f   : > { %539 = vrcp.f32 %v309_v36  ;;  %v383_v41 = vadd.f32 1.0, %v528_v39  ;;  %v530_v42 = vpop.eup %529 }
 0x170   : > { %v382_v43 = vadd.f32 1.0, %v530_v42  ;;  %v532_v44 = vpop.eup %531 }
 0x171   : > { %541 = vrcp.f32 %v383_v41  ;;  %v534_v45 = vpop.eup %533  ;;  %v394_v48 = vmul.f32 %v532_v44, %v614_v8  ;;  %v395_v49 = vmul.f32 %v532_v44, %v616_v9 }
 0x172   : > { %543 = vrcp.f32 %v308_v40  ;;  %v392_v53 = vmul.f32 %v534_v45, %v606_v4  ;;  %v393_v54 = vmul.f32 %v534_v45, %v608_v5 }
 0x173   : > { %545 = vrcp.f32 %v382_v43 }
 0x177   : > { %v536_v46 = vpop.eup %535 }
 0x178   : > { %v538_v47 = vpop.eup %537  ;;  %v402_v50 = vmul.f32 %v536_v46, %v602_v2  ;;  %v403_v51 = vmul.f32 %v536_v46, %v610_v6 }
 0x179   : > { %v540_v52 = vpop.eup %539  ;;  %v400_v8 = vmul.f32 %v538_v47, %v594_v0  ;;  %v401_v2 = vmul.f32 %v538_v47, %v596_v1 }
 0x17a   : > { %v410_v9 = vadd.f32 %v402_v50, %v394_v48  ;;  %v411_v6 = vadd.f32 %v403_v51, %v395_v49  ;;  %v398_v59 = vmul.f32 %v540_v52, %v638_v20  ;;  %v399_v4 = vmul.f32 %v540_v52, %v640_v21 }
 0x17b   : > { %v542_v55 = vpop.eup %541  ;;  %v408_v56 = vadd.f32 %v400_v8, %v392_v53  ;;  %v409_v57 = vadd.f32 %v401_v2, %v393_v54 }
 0x17c   : > { %v544_v58 = vpop.eup %543  ;;  %418 = vst [vmem:[%s694_s18 + $0x10] sm:$0xff] %v410_v9  ;;  %419 = vst [vmem:[%s694_s18 + $0x18] sm:$0xff] %v411_v6  ;;  %v406_v5 = vmul.f32 %v542_v55, %v634_v18  ;;  %v407_v0 = vmul.f32 %v542_v55, %v636_v19 }
 0x17d   : > { %416 = vst [vmem:[%s694_s18] sm:$0xff] %v408_v56  ;;  %417 = vst [vmem:[%s694_s18 + $0x8] sm:$0xff] %v409_v57  ;;  %v546_v1 = vpop.eup %545  ;;  %v396_v62 = vmul.f32 %v544_v58, %v626_v14  ;;  %v397_v20 = vmul.f32 %v544_v58, %v628_v15 }
 0x17e   : > { %v414_v60 = vadd.f32 %v406_v5, %v398_v59  ;;  %v415_v61 = vadd.f32 %v407_v0, %v399_v4  ;;  %v404_v63 = vmul.f32 %v546_v1, %v622_v12  ;;  %v405_v21 = vmul.f32 %v546_v1, %v624_v13 }
 0x180   : > { %422 = vst [vmem:[%s694_s18 + $0x30] sm:$0xff] %v414_v60  ;;  %423 = vst [vmem:[%s694_s18 + $0x38] sm:$0xff] %v415_v61  ;;  %v412_v3 = vadd.f32 %v404_v63, %v396_v62  ;;  %v413_v18 = vadd.f32 %v405_v21, %v397_v20 }
 0x182   : > { %420 = vst [vmem:[%s694_s18 + $0x20] sm:$0xff] %v412_v3  ;;  %421 = vst [vmem:[%s694_s18 + $0x28] sm:$0xff] %v413_v18 }
 0x183 PF: > { %s14_s15 = sadd.s32 1, %s553_s15  }
 0x184   : > { %p11_p4 = scmp.ge.s32.totalorder %s14_s15, 4  }
 0x186   :  { %13 = sbr.rel (!%p11_p4) target bundleno = 1 (0x1), region = 69 }

</bundles_post_ra>
